<compile_context>
chip_gen: v6e
topology: v6e:2x2x1
jax: 0.10.0
libtpu: 0.0.40
codegen_flags: <defaults>
</compile_context>

<pallas_src>
import jax
import jax.numpy as jnp
from jax import lax
from jax.experimental import pallas as pl
from jax.experimental.pallas import tpu as pltpu

_LANE = 128
_MAX_LANE_GROUPS = 64                  # bounds the unrolled per-chunk add loop
_MAX_TN = _MAX_LANE_GROUPS * _LANE     # 8192 elements per row per chunk
_TARGET_TILE_BYTES = 8 << 20           # ~8 MiB of DMA per input per grid step
_MAX_TB = 1024


def _round_up(a, m):
    return (a + m - 1) // m * m


def _cdiv(a, b):
    return (a + b - 1) // b


def _vmem_capacity_bytes():
    try:
        info = pltpu.get_tpu_info()
        cap = getattr(info, "vmem_capacity_bytes", None)
        if cap:
            return int(cap)
    except Exception:
        pass
    return 64 << 20  # conservative default (v7x-sized)


def _make_nmse_kernel(*, tb, tn, B, N, num_n_blocks, row_mask_needed):
    groups = tn // _LANE
    nk = num_n_blocks
    last_start = (nk - 1) * tn
    col_mask_needed = (nk * tn) > N  # only the last N-chunk can have a tail

    def kernel(x_ref, xh_ref, out_ref, pow_acc, mse_acc):
        i = pl.program_id(0)
        k = pl.program_id(1)

        @pl.when(k == 0)
        def _init():
            pow_acc[...] = jnp.zeros_like(pow_acc)
            mse_acc[...] = jnp.zeros_like(mse_acc)

        # ---- accumulate this chunk, 128-lane group at a time (pure VPU adds) ----
        for g in range(groups):
            sl = slice(g * _LANE, (g + 1) * _LANE)
            g_lo = last_start + g * _LANE  # global column start in the LAST chunk

            def _process(mask_cols, sl=sl, g_lo=g_lo):
                x = x_ref[:, sl].astype(jnp.float32)
                xh = xh_ref[:, sl].astype(jnp.float32)
                if mask_cols:
                    # Mask tail columns BEFORE squaring: pad value 0.5 makes both
                    # the power and the mse contributions exactly 0.
                    col = g_lo + lax.broadcasted_iota(jnp.int32, (tb, _LANE), 1)
                    keep = col < N
                    x = jnp.where(keep, x, 0.5)
                    xh = jnp.where(keep, xh, 0.5)
                xc = x - 0.5
                d = x - xh                      # the 0.5 offsets cancel in the diff
                pow_acc[...] += xc * xc
                mse_acc[...] += d * d

            if (not col_mask_needed) or (g_lo + _LANE <= N):
                # This lane group is fully valid in every chunk.
                _process(False)
            elif g_lo >= N:
                # Fully past N in the last chunk: skip there, normal elsewhere.
                @pl.when(k != nk - 1)
                def _():
                    _process(False)
            else:
                # The single boundary lane group.
                @pl.when(k != nk - 1)
                def _():
                    _process(False)

                @pl.when(k == nk - 1)
                def _():
                    _process(True)

        # ---- finalize: one cross-lane reduce + division per batch block ----
        @pl.when(k == nk - 1)
        def _finalize():
            pow_l = pow_acc[...]
            mse_l = mse_acc[...]
            if row_mask_needed:
                # Batch-tail rows contain unspecified data: force power=1, mse=0
                # so their per-sample NMSE contribution is exactly 0.
                row = i * tb + lax.broadcasted_iota(jnp.int32, (tb, _LANE), 0)
                keep = row < B
                pow_l = jnp.where(keep, pow_l, 1.0)
                mse_l = jnp.where(keep, mse_l, 0.0)
            pow_s = jnp.sum(pow_l, axis=-1, keepdims=True)   # (tb, 1)
            mse_s = jnp.sum(mse_l, axis=-1, keepdims=True)   # (tb, 1)
            nmse = mse_s / pow_s                             # inf/nan iff power==0 (matches torch)
            partial = jnp.sum(nmse, keepdims=True)           # (1, 1) block partial
            out_ref[...] = jnp.broadcast_to(partial, out_ref.shape)

    return kernel


def nmse_loss(x, x_hat, reduction="mean"):
    """x, x_hat: [B, H, W, 2] float arrays. Returns scalar NMSE loss."""
    assert x.shape == x_hat.shape
    assert x.ndim >= 2
    B = x.shape[0]
    N = int(x.size // B)  # H * W * 2 elements per sample

    x2 = x.reshape(B, N)
    xh2 = x_hat.reshape(B, N).astype(x2.dtype)
    itemsize = x2.dtype.itemsize

    # ---- feature (N) tiling: minimize per-row padding, bounded lane groups ----
    n128 = max(_round_up(N, _LANE), _LANE)
    num_n_blocks = _cdiv(n128, _MAX_TN)
    tn = _round_up(_cdiv(n128, num_n_blocks), _LANE)

    # ---- batch (B) tiling: byte-targeted DMA per step, minimal batch padding,
    #      and >= 2 'parallel' blocks when possible (v7x has 2 TensorCores). ----
    row_align = 16 if itemsize == 2 else 8
    if B < row_align:
        tb = B                      # full-dim block: no batch-row masking needed
        num_b_blocks = 1
        # TODO(synk): for tiny B with huge N on v7x, a split of the N reduction into
        # 2 parallel super-chunks would be needed to use both TensorCores.
    else:
        tb_cap = max(row_align, _TARGET_TILE_BYTES // (tn * itemsize))
        tb_cap = min(_MAX_TB, (tb_cap // row_align) * row_align)
        num_b_blocks = _cdiv(B, tb_cap)
        if num_b_blocks < 2 and B >= 2 * row_align:
            num_b_blocks = 2        # keep the megacore 'parallel' axis populated
        tb = _round_up(_cdiv(B, num_b_blocks), row_align)
        num_b_blocks = _cdiv(B, tb)

    row_mask_needed = (num_b_blocks * tb) != B

    kernel = _make_nmse_kernel(
        tb=tb, tn=tn, B=B, N=N,
        num_n_blocks=num_n_blocks,
        row_mask_needed=row_mask_needed,
    )

    # ---- generation-aware VMEM budget (2 inputs, double-buffered, + scratch) ----
    tile_bytes = tb * tn * itemsize
    vmem_need = 2 * 2 * tile_bytes + 2 * tb * _LANE * 4 + (2 << 20)
    vmem_cap = _vmem_capacity_bytes()
    vmem_limit = int(min(int(vmem_cap * 0.7), 100 << 20))   # ~44 MiB on v7x, ~90 MiB on v5e/v6e
    vmem_limit = int(max(vmem_limit, vmem_need, 32 << 20))

    partials = pl.pallas_call(
        kernel,
        out_shape=jax.ShapeDtypeStruct((num_b_blocks, _LANE), jnp.float32),
        grid_spec=pltpu.PrefetchScalarGridSpec(
            num_scalar_prefetch=0,
            grid=(num_b_blocks, num_n_blocks),
            in_specs=[
                pl.BlockSpec((tb, tn), lambda i, k: (i, k)),
                pl.BlockSpec((tb, tn), lambda i, k: (i, k)),
            ],
            out_specs=pl.BlockSpec((1, _LANE), lambda i, k: (i, 0)),
            scratch_shapes=[
                pltpu.VMEM((tb, _LANE), jnp.float32),  # per-sample power partials (lane-dense)
                pltpu.VMEM((tb, _LANE), jnp.float32),  # per-sample mse partials (lane-dense)
            ],
        ),
        compiler_params=pltpu.CompilerParams(
            dimension_semantics=("parallel", "arbitrary"),
            vmem_limit_bytes=vmem_limit,
        ),
    )(x2, xh2)

    total = jnp.sum(partials[:, 0])  # sum of per-sample NMSEs
    if reduction == "mean":
        return total / jnp.float32(B)
    return total  # PyTorch module: any non-'mean' reduction is a sum


def _nmse_ref(x, x_hat, reduction="mean"):
    """Pure-JAX reference mirroring the PyTorch NMSE_cuda + reduction."""
    B = x.shape[0]
    xr = x[:, :, :, 0].reshape(B, -1) - 0.5
    xi = x[:, :, :, 1].reshape(B, -1) - 0.5
    hr = x_hat[:, :, :, 0].reshape(B, -1) - 0.5
    hi = x_hat[:, :, :, 1].reshape(B, -1) - 0.5
    power = jnp.sum(xr ** 2 + xi ** 2, axis=1)
    mse = jnp.sum((xr - hr) ** 2 + (xi - hi) ** 2, axis=1)
    nmse = mse / power
    return jnp.mean(nmse) if reduction == "mean" else jnp.sum(nmse)


if __name__ == "__main__":
    # TODO(synk): NMSELoss.loss_history / max_len / iter bookkeeping is host-side
    # state unrelated to the forward math; not implemented in the kernel.
    key = jax.random.PRNGKey(0)
    k1, k2 = jax.random.split(key)

    # Primary test: shape family implied by the module ([B, H, W, 2]).
    B, H, W = 2, 16, 16
    x = jax.random.uniform(k1, (B, H, W, 2), dtype=jnp.float32)
    x_hat = jax.random.uniform(k2, (B, H, W, 2), dtype=jnp.float32)

    loss = jax.block_until_ready(nmse_loss(x, x_hat))
    ref = jax.block_until_ready(_nmse_ref(x, x_hat))
    assert jnp.allclose(loss, ref, rtol=1e-5, atol=1e-6), (loss, ref)

    loss_sum = jax.block_until_ready(nmse_loss(x, x_hat, reduction="sum"))
    ref_sum = jax.block_until_ready(_nmse_ref(x, x_hat, reduction="sum"))
    assert jnp.allclose(loss_sum, ref_sum, rtol=1e-5, atol=1e-6), (loss_sum, ref_sum)

    # Awkward-shape test: exercises the in-kernel column-tail mask (N % 128 != 0)
    # and batch-tail row mask (B % 8 != 0) that replaced the wrapper-side padding.
    B2, H2, W2 = 10, 9, 7  # N = 126
    xb = jax.random.uniform(k1, (B2, H2, W2, 2), dtype=jnp.float32)
    xhb = jax.random.uniform(k2, (B2, H2, W2, 2), dtype=jnp.float32)
    out2 = jax.block_until_ready(nmse_loss(xb, xhb))
    ref2 = jax.block_until_ready(_nmse_ref(xb, xhb))
    assert jnp.allclose(out2, ref2, rtol=1e-5, atol=1e-6), (out2, ref2)

    print("KERNEL_OK")
</pallas_src>

<mosaic_0001>
module attributes {stable_mosaic.version = 11 : i64} {
  func.func @kernel(%arg0: i32, %arg1: i32, %arg2: memref<2x512xf32, #tpu.memory_space<vmem>>, %arg3: memref<2x512xf32, #tpu.memory_space<vmem>>, %arg4: memref<1x128xf32, #tpu.memory_space<vmem>>, %arg5: memref<2x128xf32, #tpu.memory_space<vmem>>, %arg6: memref<2x128xf32, #tpu.memory_space<vmem>>) attributes {dimension_semantics = [#tpu.dimension_semantics<parallel>, #tpu.dimension_semantics<arbitrary>], iteration_bounds = array<i64: 1, 1>, scalar_prefetch = 0 : i64, scratch_operands = 2 : i64, tpu.core_type = #tpu.core_type<tc>, window_params = [{transform_indices = @transform_0, window_bounds = array<i64: 2, 512>}, {transform_indices = @transform_1, window_bounds = array<i64: 2, 512>}, {transform_indices = @transform_2, window_bounds = array<i64: 1, 128>}]} {
    %c0_i32 = arith.constant 0 : i32
    %0 = arith.cmpi eq, %arg1, %c0_i32 : i32
    %1 = arith.extui %0 : i1 to i32
    %c0_i32_0 = arith.constant 0 : i32
    %2 = arith.cmpi ne, %1, %c0_i32_0 : i32
    scf.if %2 {
      %cst_50 = arith.constant 0.000000e+00 : f32
      %58 = vector.broadcast %cst_50 : f32 to vector<2x128xf32>
      %c0_51 = arith.constant 0 : index
      %c0_52 = arith.constant 0 : index
      %59 = vector.load %arg5[%c0_51, %c0_52] : memref<2x128xf32, #tpu.memory_space<vmem>>, vector<2x128xf32>
      tpu.vector_store %arg5[%c0_51, %c0_52], %58 {strides = array<i32>} : memref<2x128xf32, #tpu.memory_space<vmem>>, vector<2x128xf32>,
      %cst_53 = arith.constant 0.000000e+00 : f32
      %60 = vector.broadcast %cst_53 : f32 to vector<2x128xf32>
      %c0_54 = arith.constant 0 : index
      %c0_55 = arith.constant 0 : index
      %61 = vector.load %arg6[%c0_54, %c0_55] : memref<2x128xf32, #tpu.memory_space<vmem>>, vector<2x128xf32>
      tpu.vector_store %arg6[%c0_54, %c0_55], %60 {strides = array<i32>} : memref<2x128xf32, #tpu.memory_space<vmem>>, vector<2x128xf32>,
    } else {
    }
    %c0 = arith.constant 0 : index
    %c0_1 = arith.constant 0 : index
    %3 = vector.load %arg2[%c0, %c0_1] : memref<2x512xf32, #tpu.memory_space<vmem>>, vector<2x128xf32>
    %c0_2 = arith.constant 0 : index
    %c0_3 = arith.constant 0 : index
    %4 = vector.load %arg3[%c0_2, %c0_3] : memref<2x512xf32, #tpu.memory_space<vmem>>, vector<2x128xf32>
    %cst = arith.constant 5.000000e-01 : f32
    %5 = vector.broadcast %cst : f32 to vector<2x128xf32>
    %6 = arith.subf %3, %5 : vector<2x128xf32>
    %7 = arith.subf %3, %4 : vector<2x128xf32>
    %c0_4 = arith.constant 0 : index
    %c0_5 = arith.constant 0 : index
    %8 = vector.load %arg5[%c0_4, %c0_5] : memref<2x128xf32, #tpu.memory_space<vmem>>, vector<2x128xf32>
    %9 = arith.mulf %6, %6 : vector<2x128xf32>
    %10 = arith.addf %8, %9 : vector<2x128xf32>
    %c0_6 = arith.constant 0 : index
    %c0_7 = arith.constant 0 : index
    %11 = vector.load %arg5[%c0_6, %c0_7] : memref<2x128xf32, #tpu.memory_space<vmem>>, vector<2x128xf32>
    tpu.vector_store %arg5[%c0_6, %c0_7], %10 {strides = array<i32>} : memref<2x128xf32, #tpu.memory_space<vmem>>, vector<2x128xf32>,
    %c0_8 = arith.constant 0 : index
    %c0_9 = arith.constant 0 : index
    %12 = vector.load %arg6[%c0_8, %c0_9] : memref<2x128xf32, #tpu.memory_space<vmem>>, vector<2x128xf32>
    %13 = arith.mulf %7, %7 : vector<2x128xf32>
    %14 = arith.addf %12, %13 : vector<2x128xf32>
    %c0_10 = arith.constant 0 : index
    %c0_11 = arith.constant 0 : index
    %15 = vector.load %arg6[%c0_10, %c0_11] : memref<2x128xf32, #tpu.memory_space<vmem>>, vector<2x128xf32>
    tpu.vector_store %arg6[%c0_10, %c0_11], %14 {strides = array<i32>} : memref<2x128xf32, #tpu.memory_space<vmem>>, vector<2x128xf32>,
    %c0_12 = arith.constant 0 : index
    %c128 = arith.constant 128 : index
    %16 = vector.load %arg2[%c0_12, %c128] : memref<2x512xf32, #tpu.memory_space<vmem>>, vector<2x128xf32>
    %c0_13 = arith.constant 0 : index
    %c128_14 = arith.constant 128 : index
    %17 = vector.load %arg3[%c0_13, %c128_14] : memref<2x512xf32, #tpu.memory_space<vmem>>, vector<2x128xf32>
    %cst_15 = arith.constant 5.000000e-01 : f32
    %18 = vector.broadcast %cst_15 : f32 to vector<2x128xf32>
    %19 = arith.subf %16, %18 : vector<2x128xf32>
    %20 = arith.subf %16, %17 : vector<2x128xf32>
    %c0_16 = arith.constant 0 : index
    %c0_17 = arith.constant 0 : index
    %21 = vector.load %arg5[%c0_16, %c0_17] : memref<2x128xf32, #tpu.memory_space<vmem>>, vector<2x128xf32>
    %22 = arith.mulf %19, %19 : vector<2x128xf32>
    %23 = arith.addf %21, %22 : vector<2x128xf32>
    %c0_18 = arith.constant 0 : index
    %c0_19 = arith.constant 0 : index
    %24 = vector.load %arg5[%c0_18, %c0_19] : memref<2x128xf32, #tpu.memory_space<vmem>>, vector<2x128xf32>
    tpu.vector_store %arg5[%c0_18, %c0_19], %23 {strides = array<i32>} : memref<2x128xf32, #tpu.memory_space<vmem>>, vector<2x128xf32>,
    %c0_20 = arith.constant 0 : index
    %c0_21 = arith.constant 0 : index
    %25 = vector.load %arg6[%c0_20, %c0_21] : memref<2x128xf32, #tpu.memory_space<vmem>>, vector<2x128xf32>
    %26 = arith.mulf %20, %20 : vector<2x128xf32>
    %27 = arith.addf %25, %26 : vector<2x128xf32>
    %c0_22 = arith.constant 0 : index
    %c0_23 = arith.constant 0 : index
    %28 = vector.load %arg6[%c0_22, %c0_23] : memref<2x128xf32, #tpu.memory_space<vmem>>, vector<2x128xf32>
    tpu.vector_store %arg6[%c0_22, %c0_23], %27 {strides = array<i32>} : memref<2x128xf32, #tpu.memory_space<vmem>>, vector<2x128xf32>,
    %c0_24 = arith.constant 0 : index
    %c256 = arith.constant 256 : index
    %29 = vector.load %arg2[%c0_24, %c256] : memref<2x512xf32, #tpu.memory_space<vmem>>, vector<2x128xf32>
    %c0_25 = arith.constant 0 : index
    %c256_26 = arith.constant 256 : index
    %30 = vector.load %arg3[%c0_25, %c256_26] : memref<2x512xf32, #tpu.memory_space<vmem>>, vector<2x128xf32>
    %cst_27 = arith.constant 5.000000e-01 : f32
    %31 = vector.broadcast %cst_27 : f32 to vector<2x128xf32>
    %32 = arith.subf %29, %31 : vector<2x128xf32>
    %33 = arith.subf %29, %30 : vector<2x128xf32>
    %c0_28 = arith.constant 0 : index
    %c0_29 = arith.constant 0 : index
    %34 = vector.load %arg5[%c0_28, %c0_29] : memref<2x128xf32, #tpu.memory_space<vmem>>, vector<2x128xf32>
    %35 = arith.mulf %32, %32 : vector<2x128xf32>
    %36 = arith.addf %34, %35 : vector<2x128xf32>
    %c0_30 = arith.constant 0 : index
    %c0_31 = arith.constant 0 : index
    %37 = vector.load %arg5[%c0_30, %c0_31] : memref<2x128xf32, #tpu.memory_space<vmem>>, vector<2x128xf32>
    tpu.vector_store %arg5[%c0_30, %c0_31], %36 {strides = array<i32>} : memref<2x128xf32, #tpu.memory_space<vmem>>, vector<2x128xf32>,
    %c0_32 = arith.constant 0 : index
    %c0_33 = arith.constant 0 : index
    %38 = vector.load %arg6[%c0_32, %c0_33] : memref<2x128xf32, #tpu.memory_space<vmem>>, vector<2x128xf32>
    %39 = arith.mulf %33, %33 : vector<2x128xf32>
    %40 = arith.addf %38, %39 : vector<2x128xf32>
    %c0_34 = arith.constant 0 : index
    %c0_35 = arith.constant 0 : index
    %41 = vector.load %arg6[%c0_34, %c0_35] : memref<2x128xf32, #tpu.memory_space<vmem>>, vector<2x128xf32>
    tpu.vector_store %arg6[%c0_34, %c0_35], %40 {strides = array<i32>} : memref<2x128xf32, #tpu.memory_space<vmem>>, vector<2x128xf32>,
    %c0_36 = arith.constant 0 : index
    %c384 = arith.constant 384 : index
    %42 = vector.load %arg2[%c0_36, %c384] : memref<2x512xf32, #tpu.memory_space<vmem>>, vector<2x128xf32>
    %c0_37 = arith.constant 0 : index
    %c384_38 = arith.constant 384 : index
    %43 = vector.load %arg3[%c0_37, %c384_38] : memref<2x512xf32, #tpu.memory_space<vmem>>, vector<2x128xf32>
    %cst_39 = arith.constant 5.000000e-01 : f32
    %44 = vector.broadcast %cst_39 : f32 to vector<2x128xf32>
    %45 = arith.subf %42, %44 : vector<2x128xf32>
    %46 = arith.subf %42, %43 : vector<2x128xf32>
    %c0_40 = arith.constant 0 : index
    %c0_41 = arith.constant 0 : index
    %47 = vector.load %arg5[%c0_40, %c0_41] : memref<2x128xf32, #tpu.memory_space<vmem>>, vector<2x128xf32>
    %48 = arith.mulf %45, %45 : vector<2x128xf32>
    %49 = arith.addf %47, %48 : vector<2x128xf32>
    %c0_42 = arith.constant 0 : index
    %c0_43 = arith.constant 0 : index
    %50 = vector.load %arg5[%c0_42, %c0_43] : memref<2x128xf32, #tpu.memory_space<vmem>>, vector<2x128xf32>
    tpu.vector_store %arg5[%c0_42, %c0_43], %49 {strides = array<i32>} : memref<2x128xf32, #tpu.memory_space<vmem>>, vector<2x128xf32>,
    %c0_44 = arith.constant 0 : index
    %c0_45 = arith.constant 0 : index
    %51 = vector.load %arg6[%c0_44, %c0_45] : memref<2x128xf32, #tpu.memory_space<vmem>>, vector<2x128xf32>
    %52 = arith.mulf %46, %46 : vector<2x128xf32>
    %53 = arith.addf %51, %52 : vector<2x128xf32>
    %c0_46 = arith.constant 0 : index
    %c0_47 = arith.constant 0 : index
    %54 = vector.load %arg6[%c0_46, %c0_47] : memref<2x128xf32, #tpu.memory_space<vmem>>, vector<2x128xf32>
    tpu.vector_store %arg6[%c0_46, %c0_47], %53 {strides = array<i32>} : memref<2x128xf32, #tpu.memory_space<vmem>>, vector<2x128xf32>,
    %c0_i32_48 = arith.constant 0 : i32
    %55 = arith.cmpi eq, %arg1, %c0_i32_48 : i32
    %56 = arith.extui %55 : i1 to i32
    %c0_i32_49 = arith.constant 0 : i32
    %57 = arith.cmpi ne, %56, %c0_i32_49 : i32
    scf.if %57 {
      %c0_50 = arith.constant 0 : index
      %c0_51 = arith.constant 0 : index
      %58 = vector.load %arg5[%c0_50, %c0_51] : memref<2x128xf32, #tpu.memory_space<vmem>>, vector<2x128xf32>
      %c0_52 = arith.constant 0 : index
      %c0_53 = arith.constant 0 : index
      %59 = vector.load %arg6[%c0_52, %c0_53] : memref<2x128xf32, #tpu.memory_space<vmem>>, vector<2x128xf32>
      %cst_54 = arith.constant dense<0.000000e+00> : vector<2xf32>
      %60 = vector.multi_reduction <add>, %58, %cst_54 [1] : vector<2x128xf32> to vector<2xf32>
      %61 = vector.shape_cast %60 : vector<2xf32> to vector<2x1xf32>
      %cst_55 = arith.constant dense<0.000000e+00> : vector<2xf32>
      %62 = vector.multi_reduction <add>, %59, %cst_55 [1] : vector<2x128xf32> to vector<2xf32>
      %63 = vector.shape_cast %62 : vector<2xf32> to vector<2x1xf32>
      %64 = arith.divf %63, %61 : vector<2x1xf32>
      %65 = vector.shape_cast %64 : vector<2x1xf32> to vector<1x2x1xf32>
      %cst_56 = arith.constant dense<0.000000e+00> : vector<1xf32>
      %66 = vector.multi_reduction <add>, %65, %cst_56 [1, 2] : vector<1x2x1xf32> to vector<1xf32>
      %67 = vector.shape_cast %66 : vector<1xf32> to vector<1x1x1xf32>
      %68 = vector.extract %67[0, 0, 0] : f32 from vector<1x1x1xf32>
      %69 = vector.broadcast %68 : f32 to vector<1x1xf32>
      %70 = vector.shape_cast %69 : vector<1x1xf32> to vector<1x1xf32>
      %71 = vector.broadcast %70 : vector<1x1xf32> to vector<1x128xf32>
      %c0_57 = arith.constant 0 : index
      %c0_58 = arith.constant 0 : index
      %72 = vector.load %arg4[%c0_57, %c0_58] : memref<1x128xf32, #tpu.memory_space<vmem>>, vector<1x128xf32>
      tpu.vector_store %arg4[%c0_57, %c0_58], %71 {strides = array<i32>} : memref<1x128xf32, #tpu.memory_space<vmem>>, vector<1x128xf32>,
    } else {
    }
    return
  }
  func.func @transform_0(%arg0: i32, %arg1: i32) -> (i32, i32) {
    %c0_i32 = arith.constant 0 : i32
    return %arg0, %arg1 : i32, i32
  }
  func.func @transform_1(%arg0: i32, %arg1: i32) -> (i32, i32) {
    %c0_i32 = arith.constant 0 : i32
    return %arg0, %arg1 : i32, i32
  }
  func.func @transform_2(%arg0: i32, %arg1: i32) -> (i32, i32) {
    %c0_i32 = arith.constant 0 : i32
    %c0_i32_0 = arith.constant 0 : i32
    return %arg0, %c0_i32 : i32, i32
  }
}

</mosaic_0001>

<bundles_post_ra>
// kernel: tpu_custom_call.1
= control target key start
LH: loop header
LB: loop body
LE: loop exit
PB: predicated region body
PF: predicated region fallthrough
CT: control target
= control target key end

     0   :  { %7 = vsyncpa [#allocation5], 0  ;;  %s239_s0 = inlined_call_operand.hbm [shape: f32[2,512], index: 0, kind: input, shape index: {}]   ;;  %s240_s1 = inlined_call_operand.hbm [shape: f32[2,512], index: 1, kind: input, shape index: {}]   ;;  %s241_s2 = inlined_call_operand.hbm [shape: f32[1,128], index: 2, kind: output, shape index: {}]  }
   0x1   :  { %8 = vsyncpa [#allocation8], 0 }
   0x2   :  { %9 = vsyncpa [#allocation6], 0  ;;  %s211_s9 = smov [#allocation4]   ;;  %s212_s11 = smov [#allocation7]  }
   0x3   :  { %s16_s10 = sshll.u32 %s211_s9, 4  ;;  %s26_s12 = sshll.u32 %s212_s11, 4  ;;  %s17_s10 = int_to_ptr.vmem [resolvable:$true] %s16_s10  ;;  %s27_s12 = int_to_ptr.vmem [resolvable:$true] %s26_s12 }
   0x4   :  { %s153_s13 = scalar_lea.vmem %s17_s10, 128  ;;  %p158_p1 = scmp.lt.s32.totalorder %s17_s10, %s17_s10 }
   0x5   :  { %p154_p0 = scmp.ne.s32.totalorder %s17_s10, %s153_s13  ;;  %p159_p2 = scmp.lt.s32.totalorder %s153_s13, %s153_s13 }
   0x7   :  { %p160_p3 = por %p159_p2, %p158_p1 }
   0x9   :  { %p161_p4 = pnand %p160_p3, %p154_p0 }
   0xb   :  { %164 = shalt.err (!%p161_p4)
}
   0xc   :  { %19 = dma.hbm_to_vmem [thread:$0]  %s239_s0, 128, %s17_s10, [#allocation5]  }
   0xd   :  { %s173_s16 = scalar_lea.vmem %s27_s12, 128  ;;  %p178_p6 = scmp.lt.s32.totalorder %s27_s12, %s27_s12 }
   0xe   :  { %p174_p5 = scmp.ne.s32.totalorder %s27_s12, %s173_s16  ;;  %p179_p7 = scmp.lt.s32.totalorder %s173_s16, %s173_s16 }
  0x10   :  { %p180_p8 = por %p179_p7, %p178_p6 }
  0x12   :  { %p181_p9 = pnand %p180_p8, %p174_p5 }
  0x14   :  { %184 = shalt.err (!%p181_p9)
}
  0x15   :  { %29 = dma.hbm_to_vmem [thread:$0]  %s240_s1, 128, %s27_s12, [#allocation8]  }
  0x16   :  { %205 = dma.done.wait [#allocation5], 128  }
  0x17   :  { %206 = vsyncadd [#allocation5], 4294967168 }
  0x18   :  { %207 = dma.done.wait [#allocation8], 128  }
  0x19   :  { %208 = vsyncadd [#allocation8], 4294967168  ;;  %v213_v0 = vmov 0.0   ;;  %v42_v1 = vld [vmem:[#allocation4] sm:$0x3]  ;;  %vm95_vm0 = vcmask 1041408  }
  0x1a   :  { %40 = vst [vmem:[#allocation2] sm:$0x3] %v213_v0  ;;  %41 = vst [vmem:[#allocation3] sm:$0x3] %v213_v0  ;;  %v133_v2 = vadd.f32 -0.5, %v42_v1  ;;  %vm104_vm1 = vcmask 1024  }
  0x1b   :  { %v43_v4 = vld [vmem:[#allocation7] sm:$0x3]  ;;  %v54_v6 = vld [vmem:[#allocation4 + $0x2] sm:$0x3]  ;;  %v55_v12 = vld [vmem:[#allocation7 + $0x2] sm:$0x3] }
  0x1c   :  { %v47_v5 = vmul.f32 %v133_v2, %v133_v2  ;;  %v45_v7 = vsub.f32 %v42_v1, %v43_v4  ;;  %v134_v11 = vadd.f32 -0.5, %v54_v6  ;;  %v57_v14 = vsub.f32 %v54_v6, %v55_v12  ;;  %v66_v17 = vld [vmem:[#allocation4 + $0x4] sm:$0x3]  ;;  %v67_v22 = vld [vmem:[#allocation7 + $0x4] sm:$0x3]  ;;  %s214_s0 = smov [#allocation9]  }
  0x1d   :  { %v135_v20 = vadd.f32 -0.5, %v66_v17  ;;  %v69_v24 = vsub.f32 %v66_v17, %v67_v22  ;;  %v78_v27 = vld [vmem:[#allocation4 + $0x6] sm:$0x3]  ;;  %v79_v32 = vld [vmem:[#allocation7 + $0x6] sm:$0x3]  ;;  %s123_s1 = sshll.u32 %s214_s0, 4  ;;  %s124_s1 = int_to_ptr.vmem [resolvable:$true] %s123_s1 }
  0x1e   :  { %v51_v10 = vmul.f32 %v45_v7, %v45_v7  ;;  %v59_v15 = vmul.f32 %v134_v11, %v134_v11  ;;  %v63_v18 = vmul.f32 %v57_v14, %v57_v14  ;;  %v136_v30 = vadd.f32 -0.5, %v78_v27  ;;  %s185_s20 = scalar_lea.vmem %s124_s1, 16  ;;  %s189_s21 = scalar_lea.vmem %s124_s1, 32 }
  0x1f   :  { %v71_v25 = vmul.f32 %v135_v20, %v135_v20  ;;  %v75_v28 = vmul.f32 %v69_v24, %v69_v24  ;;  %v81_v34 = vsub.f32 %v78_v27, %v79_v32  ;;  %p186_p10 = scmp.ne.s32.totalorder %s124_s1, %s185_s20  ;;  %p190_p11 = scmp.lt.s32.totalorder %s124_s1, %s124_s1 }
  0x20   :  { %v83_v35 = vmul.f32 %v136_v30, %v136_v30  ;;  %p191_p12 = scmp.lt.s32.totalorder %s189_s21, %s185_s20 }
  0x21   :  { %v46_v3 = vld [vmem:[#allocation2] sm:$0x3]  ;;  %v50_v9 = vld [vmem:[#allocation3] sm:$0x3]  ;;  %v87_v37 = vmul.f32 %v81_v34, %v81_v34 }
  0x22   :  { %v48_v8 = vadd.f32 %v47_v5, %v46_v3  ;;  %v52_v13 = vadd.f32 %v51_v10, %v50_v9  ;;  %p192_p13 = por %p191_p12, %p190_p11 }
  0x24   :  { %49 = vst [vmem:[#allocation2] sm:$0x3] %v48_v8  ;;  %53 = vst [vmem:[#allocation3] sm:$0x3] %v52_v13  ;;  %p193_p0 = pnand %p192_p13, %p186_p10 }
  0x2b   :  { %v58_v16 = vld [vmem:[#allocation2] sm:$0x3]  ;;  %v62_v21 = vld [vmem:[#allocation3] sm:$0x3] }
  0x2c   :  { %v60_v19 = vadd.f32 %v59_v15, %v58_v16  ;;  %v64_v23 = vadd.f32 %v63_v18, %v62_v21 }
  0x2e   :  { %61 = vst [vmem:[#allocation2] sm:$0x3] %v60_v19  ;;  %65 = vst [vmem:[#allocation3] sm:$0x3] %v64_v23 }
  0x35   :  { %v70_v26 = vld [vmem:[#allocation2] sm:$0x3]  ;;  %v74_v31 = vld [vmem:[#allocation3] sm:$0x3] }
  0x36   :  { %v72_v29 = vadd.f32 %v71_v25, %v70_v26  ;;  %v76_v33 = vadd.f32 %v75_v28, %v74_v31 }
  0x38   :  { %73 = vst [vmem:[#allocation2] sm:$0x3] %v72_v29  ;;  %77 = vst [vmem:[#allocation3] sm:$0x3] %v76_v33 }
  0x3f   :  { %v82_v36 = vld [vmem:[#allocation2] sm:$0x3]  ;;  %v86_v39 = vld [vmem:[#allocation3] sm:$0x3] }
  0x40   :  { %v84_v38 = vadd.f32 %v83_v35, %v82_v36  ;;  %v88_v40 = vadd.f32 %v87_v37, %v86_v39 }
  0x42   :  { %85 = vst [vmem:[#allocation2] sm:$0x3] %v84_v38  ;;  %89 = vst [vmem:[#allocation3] sm:$0x3] %v88_v40 }
  0x49   :  { %v93_v41 = vld [vmem:[#allocation2] sm:$0x3]  ;;  %v94_v43 = vld [vmem:[#allocation3] sm:$0x3] }
  0x4a   :  { %v96_v42 = vsel %vm95_vm0, %v93_v41, 0.0  ;;  %v99_v44 = vsel %vm95_vm0, %v94_v43, 0.0 }
  0x4b   :  { %97 = vadd.xlane.f32.xlu0 %v96_v42 }
  0x4f   :  { %100 = vadd.xlane.f32.xlu0 %v99_v44 }
  0xd4   :  { %v98_v45 = vpop.xlane.xlu0 %97 }
  0xd5   :  { %143 = vrcp.f32 %v98_v45 }
  0xd8   :  { %v101_v46 = vpop.xlane.xlu0 %100 }
  0xe2   :  { %v144_v47 = vpop.eup %143 }
  0xe3   :  { %v103_v48 = vmul.f32 %v144_v47, %v101_v46 }
  0xe5   :  { %v105_v49 = vsel %vm104_vm1, %v103_v48, 0.0 }
  0xe6   :  { %106 = vadd.xlane.f32.xlu1 %v105_v49 }
 0x16f   :  { %v107_v50 = vpop.xlane.xlu1 %106 }
 0x170   :  { %v108_v51 = vrot.slane %v107_v50, 4 }
 0x172   :  { %v109_v52 = vadd.f32 %v108_v51, %v107_v50 }
 0x174   :  { %v110_v53 = vrot.slane %v109_v52, 2 }
 0x176   :  { %v111_v54 = vadd.f32 %v110_v53, %v109_v52 }
 0x178   :  { %v112_v55 = vrot.slane %v111_v54, 1 }
 0x17a   :  { %v113_v56 = vadd.f32 %v112_v55, %v111_v54 }
 0x17c   :  { %137 = vpush %v113_v56 }
 0x1ad   :  { %s138_s19 = spop %137 }
 0x1ae   :  { %v115_v57 = vstv %s138_s19 }
 0x1af   :  { %116 = vst [vmem:[#allocation9] sm:$0x1] %v115_v57 }
 0x1b0   :  { %196 = shalt.err (!%p193_p0)
}
 0x1b1   :  { %126 = dma.vmem_to_hbm [thread:$0]  %s124_s1, 16, %s241_s2, [#allocation6]  }
 0x1b2   :  { %209 = dma.done.wait [#allocation6], 16  }
 0x1b3   :  { %210 = vsyncadd [#allocation6], 4294967280 }
 0x1b4   :  { %130 = vsyncpa [#allocation5], 1 }
 0x1b5   :  { %131 = vsyncpa [#allocation8], 1 }
 0x1b6   :  { %132 = vsyncpa [#allocation6], 1 }

</bundles_post_ra>
